<compile_context>
chip_gen: v7x
topology: tpu7x:2x2x1
jax: 0.10.0
libtpu: 0.0.40
codegen_flags: <defaults>
</compile_context>

<pallas_src>
import jax
import jax.numpy as jnp
from jax.experimental import pallas as pl
from jax.experimental.pallas import tpu as pltpu


LEAKY_SLOPE = 0.01  # ProG `act` defaults to LeakyReLU(negative_slope=0.01)


def _gnn_kernel(x_ref, a_ref, pa_ref, w_ref, b_ref, out_ref):
    """Processes `bb` graph blocks per grid step, fully VMEM-resident.

    x_ref  : [bb, NP, PAD] bf16  node features (zero-padded rows/cols)
    a_ref  : [NP, NP]      bf16  shared GCN-normalized adjacency A_hat
    pa_ref : [GP, NP]      bf16  shared (P @ A_hat): mean-pool folded into layer 2
    w_ref  : [2, PAD, PAD] bf16  stacked GCNConv weights (zero-padded)
    b_ref  : [2, PAD]      f32   stacked GCNConv biases (zero-padded)
    out_ref: [bb, GP, PAD] f32   graph embeddings (lane-dense, unmasked store)
    """
    a = a_ref[...]
    pa = pa_ref[...]
    w1 = w_ref[0]
    w2 = w_ref[1]
    b1 = b_ref[0:1, :]
    b2 = b_ref[1:2, :]

    bb = x_ref.shape[0]
    # Static (fully unrolled) loop over the blocks packed into this grid step;
    # amortizes the fixed per-grid-step overhead for tiny graphs.
    for i in range(bb):
        # --- layer 1: GCNConv(input, hid) + LeakyReLU ---
        xw = jnp.dot(x_ref[i], w1, preferred_element_type=jnp.float32)
        h = jnp.dot(a, xw.astype(jnp.bfloat16),
                    preferred_element_type=jnp.float32) + b1
        h = jnp.where(h > 0.0, h, LEAKY_SLOPE * h)
        # TODO(synk): F.dropout(x, training=self.training) treated as eval-mode
        # identity; training mode would draw a mask via pltpu.prng_random_bits.

        # --- layer 2 + global_mean_pool, reassociated through P ---
        #   P @ (A @ (h @ W2) + b2) == ((P @ A) @ h) @ W2 + b2
        # (P rows sum to 1; padded GP rows pick up b2 but are sliced in wrapper.)
        t = jnp.dot(pa, h.astype(jnp.bfloat16),
                    preferred_element_type=jnp.float32)
        out_ref[i] = jnp.dot(t.astype(jnp.bfloat16), w2,
                             preferred_element_type=jnp.float32) + b2


def _round_up(x, m):
    return ((x + m - 1) // m) * m


def gnn_forward(x_blocks, a_hat, pool_mat, params, *, blocks_per_step=2):
    """Batched GNN forward with shared graph structure.

    x_blocks : [B, N, input_dim] f32  node features per graph block
    a_hat    : [N, N]            f32  GCN-normalized adjacency (shared)
    pool_mat : [G, N]            f32  mean-pool matrix (shared)
    params   : dict(w1 [F,H], b1 [H], w2 [H,O], b2 [O])
    returns graph embeddings [B, G, out_dim] (f32)
    """
    B, N, f_in = x_blocks.shape
    G = pool_mat.shape[0]
    hid = params["w1"].shape[1]
    out_dim = params["w2"].shape[1]

    PAD = _round_up(max(f_in, hid, out_dim), 128)  # lane-dense feature width
    NP = _round_up(N, 128)                         # lane/contraction-dense nodes
    GP = _round_up(G, 8)                           # sublane-aligned graph rows
    bb = max(1, min(blocks_per_step, B))           # blocks fused per grid step
    Bp = _round_up(B, bb)

    # ---- pack + pad operands (zero padding is exact; see kernel comments) ----
    xp = jnp.zeros((Bp, NP, PAD), jnp.bfloat16)
    xp = xp.at[:B, :N, :f_in].set(x_blocks.astype(jnp.bfloat16))

    ap_f32 = jnp.zeros((NP, NP), jnp.float32).at[:N, :N].set(a_hat)
    pp_f32 = jnp.zeros((GP, NP), jnp.float32).at[:G, :N].set(pool_mat)
    pa_f32 = jnp.dot(pp_f32, ap_f32)               # fold mean-pool into layer 2
    ap = ap_f32.astype(jnp.bfloat16)               # bf16 MXU operands
    pa = pa_f32.astype(jnp.bfloat16)

    w_stack = jnp.zeros((2, PAD, PAD), jnp.bfloat16)
    w_stack = w_stack.at[0, :f_in, :hid].set(params["w1"].astype(jnp.bfloat16))
    w_stack = w_stack.at[1, :hid, :out_dim].set(params["w2"].astype(jnp.bfloat16))
    b_stack = jnp.zeros((2, PAD), jnp.float32)
    b_stack = b_stack.at[0, :hid].set(params["b1"])
    b_stack = b_stack.at[1, :out_dim].set(params["b2"])

    out_padded = pl.pallas_call(
        _gnn_kernel,
        out_shape=jax.ShapeDtypeStruct((Bp, GP, PAD), jnp.float32),
        grid=(Bp // bb,),
        in_specs=[
            pl.BlockSpec((bb, NP, PAD), lambda b: (b, 0, 0)),   # x: per-step tile
            pl.BlockSpec((NP, NP), lambda b: (0, 0)),           # A_hat (resident)
            pl.BlockSpec((GP, NP), lambda b: (0, 0)),           # P@A   (resident)
            pl.BlockSpec((2, PAD, PAD), lambda b: (0, 0, 0)),   # weights (resident)
            pl.BlockSpec((2, PAD), lambda b: (0, 0)),           # biases  (resident)
        ],
        out_specs=pl.BlockSpec((bb, GP, PAD), lambda b: (b, 0, 0)),
        compiler_params=pltpu.CompilerParams(
            dimension_semantics=("parallel",)),                 # v7x: both TCs
    )(xp, ap, pa, w_stack, b_stack)

    return out_padded[:B, :G, :out_dim]


def build_gcn_adjacency(edge_index, num_nodes):
    """Dense GCN-normalized adjacency: D^{-1/2} (A + I) D^{-1/2}."""
    src, dst = edge_index[0], edge_index[1]
    adj = jnp.zeros((num_nodes, num_nodes), jnp.float32)
    adj = adj.at[dst, src].set(1.0)
    adj = adj + jnp.eye(num_nodes, dtype=jnp.float32)
    deg = jnp.sum(adj, axis=1)
    d_inv_sqrt = jax.lax.rsqrt(jnp.maximum(deg, 1.0))
    return d_inv_sqrt[:, None] * adj * d_inv_sqrt[None, :]


def build_mean_pool(batch_vec, num_graphs):
    """Mean-pool matrix P [G, N]: P[g, n] = 1/|graph g| if batch[n]==g else 0."""
    gids = jnp.arange(num_graphs, dtype=batch_vec.dtype)
    onehot = (batch_vec[None, :] == gids[:, None]).astype(jnp.float32)
    counts = jnp.maximum(jnp.sum(onehot, axis=1, keepdims=True), 1.0)
    return onehot / counts


def reference_forward(x_blocks, a_hat, pool_mat, p):
    """Pure-JAX reference with the same bf16/f32 precision choices as the kernel."""
    a16 = a_hat.astype(jnp.bfloat16)
    pa16 = jnp.dot(pool_mat, a_hat).astype(jnp.bfloat16)
    w1 = p["w1"].astype(jnp.bfloat16)
    w2 = p["w2"].astype(jnp.bfloat16)

    def one_block(x):
        xw = jnp.dot(x.astype(jnp.bfloat16), w1,
                     preferred_element_type=jnp.float32)
        h = jnp.dot(a16, xw.astype(jnp.bfloat16),
                    preferred_element_type=jnp.float32) + p["b1"][None, :]
        h = jnp.where(h > 0.0, h, LEAKY_SLOPE * h)
        t = jnp.dot(pa16, h.astype(jnp.bfloat16),
                    preferred_element_type=jnp.float32)
        return jnp.dot(t.astype(jnp.bfloat16), w2,
                       preferred_element_type=jnp.float32) + p["b2"][None, :]

    return jax.vmap(one_block)(x_blocks)


if __name__ == "__main__":
    # Module defaults: hid_dim = int(0.618 * input_dim), out_dim = hid_dim.
    input_dim = 32
    hid_dim = int(0.618 * input_dim)   # 19
    out_dim = hid_dim                  # 19

    B = 4                 # graph blocks; 2 blocks/step -> 2 parallel grid steps
    G = 2                 # graphs per block
    nodes_per_graph = 8
    N = G * nodes_per_graph            # 16 nodes per block

    key = jax.random.PRNGKey(0)
    kx, kw1, kw2 = jax.random.split(key, 3)

    # Node features for every block.
    x_blocks = jax.random.normal(kx, (B, N, input_dim), jnp.float32)

    # Shared graph structure: G independent undirected ring graphs.
    src, dst, batch_list = [], [], []
    for g in range(G):
        base = g * nodes_per_graph
        for i in range(nodes_per_graph):
            j = (i + 1) % nodes_per_graph
            src += [base + i, base + j]
            dst += [base + j, base + i]
        batch_list += [g] * nodes_per_graph
    edge_index = jnp.array([src, dst], jnp.int32)        # [2, E]
    batch_vec = jnp.array(batch_list, jnp.int32)         # [N]

    a_hat = build_gcn_adjacency(edge_index, N)            # [N, N]
    pool_mat = build_mean_pool(batch_vec, G)               # [G, N]

    # GCNConv parameters (PyG: glorot-ish weights, zero biases).
    params = dict(
        w1=jax.random.normal(kw1, (input_dim, hid_dim), jnp.float32)
           / jnp.sqrt(float(input_dim)),
        b1=jnp.zeros((hid_dim,), jnp.float32),
        w2=jax.random.normal(kw2, (hid_dim, out_dim), jnp.float32)
           / jnp.sqrt(float(hid_dim)),
        b2=jnp.zeros((out_dim,), jnp.float32),
    )

    out = gnn_forward(x_blocks, a_hat, pool_mat, params, blocks_per_step=2)
    out = jax.block_until_ready(out)

    ref = reference_forward(x_blocks, a_hat, pool_mat, params)
    assert out.shape == (B, G, out_dim), out.shape
    assert jnp.allclose(out, ref, atol=1e-2, rtol=1e-2), \
        float(jnp.max(jnp.abs(out - ref)))

    print("KERNEL_OK")
</pallas_src>

<mosaic_0001>
module attributes {stable_mosaic.version = 11 : i64} {
  func.func @_gnn_kernel(%arg0: i32, %arg1: memref<2x128x128xbf16, #tpu.memory_space<vmem>>, %arg2: memref<128x128xbf16, #tpu.memory_space<vmem>>, %arg3: memref<8x128xbf16, #tpu.memory_space<vmem>>, %arg4: memref<2x128x128xbf16, #tpu.memory_space<vmem>>, %arg5: memref<2x128xf32, #tpu.memory_space<vmem>>, %arg6: memref<2x8x128xf32, #tpu.memory_space<vmem>>) attributes {dimension_semantics = [#tpu.dimension_semantics<parallel>], iteration_bounds = array<i64: 2>, scalar_prefetch = 0 : i64, scratch_operands = 0 : i64, tpu.core_type = #tpu.core_type<tc>, window_params = [{transform_indices = @transform_0, window_bounds = array<i64: 2, 128, 128>}, {pipeline_mode = #tpu.pipeline_mode<synchronous>, transform_indices = @transform_1, window_bounds = array<i64: 128, 128>}, {pipeline_mode = #tpu.pipeline_mode<synchronous>, transform_indices = @transform_2, window_bounds = array<i64: 8, 128>}, {pipeline_mode = #tpu.pipeline_mode<synchronous>, transform_indices = @transform_3, window_bounds = array<i64: 2, 128, 128>}, {pipeline_mode = #tpu.pipeline_mode<synchronous>, transform_indices = @transform_4, window_bounds = array<i64: 2, 128>}, {transform_indices = @transform_5, window_bounds = array<i64: 2, 8, 128>}]} {
    %c0 = arith.constant 0 : index
    %c0_0 = arith.constant 0 : index
    %0 = vector.load %arg2[%c0, %c0_0] : memref<128x128xbf16, #tpu.memory_space<vmem>>, vector<128x128xbf16>
    %c0_1 = arith.constant 0 : index
    %c0_2 = arith.constant 0 : index
    %1 = vector.load %arg3[%c0_1, %c0_2] : memref<8x128xbf16, #tpu.memory_space<vmem>>, vector<8x128xbf16>
    %c0_3 = arith.constant 0 : index
    %c0_4 = arith.constant 0 : index
    %c0_5 = arith.constant 0 : index
    %2 = vector.load %arg4[%c0_3, %c0_4, %c0_5] : memref<2x128x128xbf16, #tpu.memory_space<vmem>>, vector<1x128x128xbf16>
    %3 = vector.shape_cast %2 : vector<1x128x128xbf16> to vector<128x128xbf16>
    %c1 = arith.constant 1 : index
    %c0_6 = arith.constant 0 : index
    %c0_7 = arith.constant 0 : index
    %4 = vector.load %arg4[%c1, %c0_6, %c0_7] : memref<2x128x128xbf16, #tpu.memory_space<vmem>>, vector<1x128x128xbf16>
    %5 = vector.shape_cast %4 : vector<1x128x128xbf16> to vector<128x128xbf16>
    %c0_8 = arith.constant 0 : index
    %c0_9 = arith.constant 0 : index
    %6 = vector.load %arg5[%c0_8, %c0_9] : memref<2x128xf32, #tpu.memory_space<vmem>>, vector<1x128xf32>
    %c1_10 = arith.constant 1 : index
    %c0_11 = arith.constant 0 : index
    %7 = vector.load %arg5[%c1_10, %c0_11] : memref<2x128xf32, #tpu.memory_space<vmem>>, vector<1x128xf32>
    %c0_12 = arith.constant 0 : index
    %c0_13 = arith.constant 0 : index
    %c0_14 = arith.constant 0 : index
    %8 = vector.load %arg1[%c0_12, %c0_13, %c0_14] : memref<2x128x128xbf16, #tpu.memory_space<vmem>>, vector<1x128x128xbf16>
    %9 = vector.shape_cast %8 : vector<1x128x128xbf16> to vector<128x128xbf16>
    %cst = arith.constant dense<0.000000e+00> : vector<128x128xf32>
    %10 = tpu.matmul %9, %3, %cst {dimension_numbers = #tpu.dot_dimension_numbers<[1], [0], [0], [1], [0, 0, 1, 1], [], []>} : vector<128x128xbf16>, vector<128x128xbf16>, vector<128x128xf32> -> vector<128x128xf32>
    %11 = arith.truncf %10 : vector<128x128xf32> to vector<128x128xbf16>
    %cst_15 = arith.constant dense<0.000000e+00> : vector<128x128xf32>
    %12 = tpu.matmul %0, %11, %cst_15 {dimension_numbers = #tpu.dot_dimension_numbers<[1], [0], [0], [1], [0, 0, 1, 1], [], []>} : vector<128x128xbf16>, vector<128x128xbf16>, vector<128x128xf32> -> vector<128x128xf32>
    %13 = vector.broadcast %6 : vector<1x128xf32> to vector<128x128xf32>
    %14 = arith.addf %12, %13 : vector<128x128xf32>
    %cst_16 = arith.constant 0.000000e+00 : f32
    %15 = vector.broadcast %cst_16 : f32 to vector<128x128xf32>
    %16 = arith.cmpf ogt, %14, %15 : vector<128x128xf32>
    %cst_17 = arith.constant 0.00999999977 : f32
    %17 = vector.broadcast %cst_17 : f32 to vector<128x128xf32>
    %18 = arith.mulf %17, %14 : vector<128x128xf32>
    %19 = arith.select %16, %14, %18 : vector<128x128xi1>, vector<128x128xf32>
    %20 = arith.truncf %19 : vector<128x128xf32> to vector<128x128xbf16>
    %cst_18 = arith.constant dense<0.000000e+00> : vector<8x128xf32>
    %21 = tpu.matmul %1, %20, %cst_18 {dimension_numbers = #tpu.dot_dimension_numbers<[1], [0], [0], [1], [0, 0, 1, 1], [], []>} : vector<8x128xbf16>, vector<128x128xbf16>, vector<8x128xf32> -> vector<8x128xf32>
    %22 = arith.truncf %21 : vector<8x128xf32> to vector<8x128xbf16>
    %cst_19 = arith.constant dense<0.000000e+00> : vector<8x128xf32>
    %23 = tpu.matmul %22, %5, %cst_19 {dimension_numbers = #tpu.dot_dimension_numbers<[1], [0], [0], [1], [0, 0, 1, 1], [], []>} : vector<8x128xbf16>, vector<128x128xbf16>, vector<8x128xf32> -> vector<8x128xf32>
    %24 = vector.broadcast %7 : vector<1x128xf32> to vector<8x128xf32>
    %25 = arith.addf %23, %24 : vector<8x128xf32>
    %c0_20 = arith.constant 0 : index
    %c0_21 = arith.constant 0 : index
    %c0_22 = arith.constant 0 : index
    %26 = vector.load %arg6[%c0_20, %c0_21, %c0_22] : memref<2x8x128xf32, #tpu.memory_space<vmem>>, vector<1x8x128xf32>
    %27 = vector.shape_cast %26 : vector<1x8x128xf32> to vector<8x128xf32>
    %28 = vector.shape_cast %25 : vector<8x128xf32> to vector<1x8x128xf32>
    tpu.vector_store %arg6[%c0_20, %c0_21, %c0_22], %28 {strides = array<i32>} : memref<2x8x128xf32, #tpu.memory_space<vmem>>, vector<1x8x128xf32>,
    %c1_23 = arith.constant 1 : index
    %c0_24 = arith.constant 0 : index
    %c0_25 = arith.constant 0 : index
    %29 = vector.load %arg1[%c1_23, %c0_24, %c0_25] : memref<2x128x128xbf16, #tpu.memory_space<vmem>>, vector<1x128x128xbf16>
    %30 = vector.shape_cast %29 : vector<1x128x128xbf16> to vector<128x128xbf16>
    %cst_26 = arith.constant dense<0.000000e+00> : vector<128x128xf32>
    %31 = tpu.matmul %30, %3, %cst_26 {dimension_numbers = #tpu.dot_dimension_numbers<[1], [0], [0], [1], [0, 0, 1, 1], [], []>} : vector<128x128xbf16>, vector<128x128xbf16>, vector<128x128xf32> -> vector<128x128xf32>
    %32 = arith.truncf %31 : vector<128x128xf32> to vector<128x128xbf16>
    %cst_27 = arith.constant dense<0.000000e+00> : vector<128x128xf32>
    %33 = tpu.matmul %0, %32, %cst_27 {dimension_numbers = #tpu.dot_dimension_numbers<[1], [0], [0], [1], [0, 0, 1, 1], [], []>} : vector<128x128xbf16>, vector<128x128xbf16>, vector<128x128xf32> -> vector<128x128xf32>
    %34 = vector.broadcast %6 : vector<1x128xf32> to vector<128x128xf32>
    %35 = arith.addf %33, %34 : vector<128x128xf32>
    %cst_28 = arith.constant 0.000000e+00 : f32
    %36 = vector.broadcast %cst_28 : f32 to vector<128x128xf32>
    %37 = arith.cmpf ogt, %35, %36 : vector<128x128xf32>
    %cst_29 = arith.constant 0.00999999977 : f32
    %38 = vector.broadcast %cst_29 : f32 to vector<128x128xf32>
    %39 = arith.mulf %38, %35 : vector<128x128xf32>
    %40 = arith.select %37, %35, %39 : vector<128x128xi1>, vector<128x128xf32>
    %41 = arith.truncf %40 : vector<128x128xf32> to vector<128x128xbf16>
    %cst_30 = arith.constant dense<0.000000e+00> : vector<8x128xf32>
    %42 = tpu.matmul %1, %41, %cst_30 {dimension_numbers = #tpu.dot_dimension_numbers<[1], [0], [0], [1], [0, 0, 1, 1], [], []>} : vector<8x128xbf16>, vector<128x128xbf16>, vector<8x128xf32> -> vector<8x128xf32>
    %43 = arith.truncf %42 : vector<8x128xf32> to vector<8x128xbf16>
    %cst_31 = arith.constant dense<0.000000e+00> : vector<8x128xf32>
    %44 = tpu.matmul %43, %5, %cst_31 {dimension_numbers = #tpu.dot_dimension_numbers<[1], [0], [0], [1], [0, 0, 1, 1], [], []>} : vector<8x128xbf16>, vector<128x128xbf16>, vector<8x128xf32> -> vector<8x128xf32>
    %45 = vector.broadcast %7 : vector<1x128xf32> to vector<8x128xf32>
    %46 = arith.addf %44, %45 : vector<8x128xf32>
    %c1_32 = arith.constant 1 : index
    %c0_33 = arith.constant 0 : index
    %c0_34 = arith.constant 0 : index
    %47 = vector.load %arg6[%c1_32, %c0_33, %c0_34] : memref<2x8x128xf32, #tpu.memory_space<vmem>>, vector<1x8x128xf32>
    %48 = vector.shape_cast %47 : vector<1x8x128xf32> to vector<8x128xf32>
    %49 = vector.shape_cast %46 : vector<8x128xf32> to vector<1x8x128xf32>
    tpu.vector_store %arg6[%c1_32, %c0_33, %c0_34], %49 {strides = array<i32>} : memref<2x8x128xf32, #tpu.memory_space<vmem>>, vector<1x8x128xf32>,
    return
  }
  func.func @transform_0(%arg0: i32) -> (i32, i32, i32) {
    %c0_i32 = arith.constant 0 : i32
    %c0_i32_0 = arith.constant 0 : i32
    %c0_i32_1 = arith.constant 0 : i32
    return %arg0, %c0_i32, %c0_i32_0 : i32, i32, i32
  }
  func.func @transform_1(%arg0: i32) -> (i32, i32) {
    %c0_i32 = arith.constant 0 : i32
    %c0_i32_0 = arith.constant 0 : i32
    %c0_i32_1 = arith.constant 0 : i32
    return %c0_i32, %c0_i32_0 : i32, i32
  }
  func.func @transform_2(%arg0: i32) -> (i32, i32) {
    %c0_i32 = arith.constant 0 : i32
    %c0_i32_0 = arith.constant 0 : i32
    %c0_i32_1 = arith.constant 0 : i32
    return %c0_i32, %c0_i32_0 : i32, i32
  }
  func.func @transform_3(%arg0: i32) -> (i32, i32, i32) {
    %c0_i32 = arith.constant 0 : i32
    %c0_i32_0 = arith.constant 0 : i32
    %c0_i32_1 = arith.constant 0 : i32
    %c0_i32_2 = arith.constant 0 : i32
    return %c0_i32, %c0_i32_0, %c0_i32_1 : i32, i32, i32
  }
  func.func @transform_4(%arg0: i32) -> (i32, i32) {
    %c0_i32 = arith.constant 0 : i32
    %c0_i32_0 = arith.constant 0 : i32
    %c0_i32_1 = arith.constant 0 : i32
    return %c0_i32, %c0_i32_0 : i32, i32
  }
  func.func @transform_5(%arg0: i32) -> (i32, i32, i32) {
    %c0_i32 = arith.constant 0 : i32
    %c0_i32_0 = arith.constant 0 : i32
    %c0_i32_1 = arith.constant 0 : i32
    return %arg0, %c0_i32, %c0_i32_0 : i32, i32, i32
  }
}

</mosaic_0001>

<bundles_post_ra>
// kernel: tpu_custom_call.1
= control target key start
LH: loop header
LB: loop body
LE: loop exit
PB: predicated region body
PF: predicated region fallthrough
CT: control target
= control target key end

     0   :  { %10 = vsyncpa [#allocation3], 0  ;;  %s2566_s0 = inlined_call_operand.hbm [shape: bf16[4,128,128], index: 0, kind: input, shape index: {}]   ;;  %s2567_s1 = inlined_call_operand.hbm [shape: bf16[128,128], index: 1, kind: input, shape index: {}]   ;;  %s2568_s2 = inlined_call_operand.vmem [shape: bf16[8,128], index: 2, kind: input, shape index: {}]   ;;  %s2569_s3 = inlined_call_operand.hbm [shape: bf16[2,128,128], index: 3, kind: input, shape index: {}]   ;;  %s2570_s4 = inlined_call_operand.vmem [shape: f32[2,128], index: 4, kind: input, shape index: {}]   ;;  %s2571_s5 = inlined_call_operand.hbm [shape: f32[4,8,128], index: 5, kind: output, shape index: {}]  }
   0x1   :  { %12 = vsyncpa [#allocation3 + $0x1], 0 }
   0x2   :  { %13 = vsyncpa [#allocation6], 0 }
   0x3   :  { %14 = vsyncpa [#allocation4], 0 }
   0x4   :  { %16 = vsyncpa [#allocation4 + $0x1], 0  ;;  %s2096_s18 = smov 0   ;;  %s2098_s19 = smov 0  }
   0x5   :  { %s2100_s20 = smov 0   ;;  %s2102_s21 = smov 0  }
   0x6 LB: > { %s2117_s22 = sadd.s32 4294967295, %s2054_s21   ;;  %s1396_s23 = sadd.s32 4294967294, %s2054_s21   ;;  %s2054_s21 = sphi %s2102_s21, %s2591_s21   ;;  %s2050_s20 = sphi %s2100_s20, %s2590_s20   ;;  %s2046_s19 = sphi %s2098_s19, %s2589_s19   ;;  %s2042_s18 = sphi %s2096_s18, %s2588_s18  }
   0x7   : > { %p42_p0 = scmp.ne.s32.totalorder %s2046_s19, %s2042_s18  ;;  %p2572_p1 = scmp.eq.s32.totalorder %s2117_s22, 0 }
   0x8   : > { %p156_p3 = scmp.eq.s32.totalorder %s1396_s23, 1  ;;  %p1397_p5 = scmp.ge.s32.totalorder %s2054_s21, 1 }
   0x9   : > { %p2126_p4 = por %p2572_p1, %p42_p0  ;;  %p163_p7 = scmp.lt.s32.totalorder %s2054_s21, 3 }
   0xa   : > { %p2131_p6 = por %p156_p3, %p42_p0  ;;  %s2056_s27 = smov [#allocation5]  }
   0xb   : > { %s2575_s24 = scalar_select %p2126_p4, 1, 0 }
   0xc   : > { %s2576_s25 = scalar_select %p2131_p6, 1, 0 }
   0xd   : > { %p2136_p8 = pnand %p1397_p5, %p163_p7  ;;  %s175_s28 = sshll.u32 %s2056_s27, 4  ;;  %s2140_s28 = int_to_ptr.vmem [resolvable:$true] %s175_s28 }
   0xe   : > { %s2057_s30 = smov [#allocation7]   ;;  %s1898_s9 = scalar_lea.hbm %s2567_s1, 1024 }
   0xf   : > { %p1797_p9 = pneg %p2136_p8  ;;  %s191_s6 = sshll.u32 %s2057_s30, 4  ;;  %s2151_s6 = int_to_ptr.vmem [resolvable:$true] %s191_s6 }
  0x10   : > { %p1899_p12 = scmp.ne.s32.totalorder %s2567_s1, %s1898_s9  ;;  %p1905_p5 = scmp.lt.u32.totalorder %s1898_s9, %s2567_s1 }
  0x11   : > { %p2147_p11 = pnand %p1797_p9, %p2572_p1 }
  0x13   : > { %p1900_p13 = pneg %p2147_p11 }
  0x15   : > { %p1901_p0 = pnand %p1900_p13, %p1899_p12 }
  0x17   : > { %p1902_p3 = pneg %p1901_p0 }
  0x19   : > { %p1907_p7 = pnand %p1905_p5, %p1902_p3 }
  0x1b   : > { %1910 = shalt.err (!%p1907_p7)
}
  0x1c   : > { %s1911_s14 = scalar_lea.vmem %s2140_s28, 1024  ;;  %p1919_p2 = scmp.lt.s32.totalorder %s2140_s28, %s2140_s28 }
  0x1d   : > { %p1912_p9 = scmp.ne.s32.totalorder %s2140_s28, %s1911_s14  ;;  %p1920_p12 = scmp.lt.s32.totalorder %s1911_s14, %s1911_s14 }
  0x1f   : > { %p1914_p10 = pnand %p1912_p9, %p1900_p13  ;;  %p1921_p0 = por %p1920_p12, %p1919_p2 }
  0x21   : > { %p1915_p1 = pneg %p1914_p10 }
  0x23   : > { %p1922_p6 = pnand %p1921_p0, %p1915_p1 }
  0x25   : > { %1925 = shalt.err (!%p1922_p6)
}
  0x26   : > { %s2058_s15 = smov 64   ;;  %s2059_s16 = smov 4  }
  0x27   : > { %1800 = dma.hbm_to_vmem [thread:$0]  (!%p2147_p11), %s2567_s1, 1024, %s2140_s28, [#allocation6], %s2058_s15, %s2058_s15, %s2059_s16  }
  0x28   : > { %s1926_s7 = scalar_lea.hbm %s2569_s3, 2048 }
  0x29   : > { %p1927_p1 = scmp.ne.s32.totalorder %s2569_s3, %s1926_s7  ;;  %p1933_p10 = scmp.lt.u32.totalorder %s1926_s7, %s2569_s3 }
  0x2b   : > { %p1929_p2 = pnand %p1927_p1, %p1900_p13 }
  0x2d   : > { %p1930_p6 = pneg %p1929_p2 }
  0x2f   : > { %p1935_p3 = pnand %p1933_p10, %p1930_p6 }
  0x31   : > { %1938 = shalt.err (!%p1935_p3)
}
  0x32   : > { %s1939_s28 = scalar_lea.vmem %s2151_s6, 2048  ;;  %p1947_p12 = scmp.lt.s32.totalorder %s2151_s6, %s2151_s6 }
  0x33   : > { %p1940_p5 = scmp.ne.s32.totalorder %s2151_s6, %s1939_s28  ;;  %p1948_p0 = scmp.lt.s32.totalorder %s1939_s28, %s1939_s28 }
  0x35   : > { %p1942_p7 = pnand %p1940_p5, %p1900_p13  ;;  %p1949_p1 = por %p1948_p0, %p1947_p12 }
  0x37   : > { %p1943_p9 = pneg %p1942_p7 }
  0x39   : > { %p1950_p2 = pnand %p1949_p1, %p1943_p9 }
  0x3b   : > { %1953 = shalt.err (!%p1950_p2)
}
  0x3c   : > { %1803 = dma.hbm_to_vmem [thread:$0]  (!%p2147_p11), %s2569_s3, 2048, %s2151_s6, [#allocation6], %s2058_s15, %s2058_s15, %s2059_s16  }
  0x3d   : > { %s2212_s29 = sadd.s32 1, %s2054_s21   ;;  %s29_s14 = sadd.s32 1, %s2050_s20 }
  0x3e   : > { %s26_s17 = ssub.s32 %s2054_s21, %s2212_s29  ;;  %p36_p13 = scmp.ne.s32.totalorder %s2050_s20, %s2046_s19 }
  0x3f   : > { %p27_p6 = scmp.eq.s32.totalorder %s26_s17, 0  ;;  %p37_p10 = scmp.eq.s32.totalorder %s2054_s21, 0 }
  0x40   : > { %p2579_p3 = scmp.eq.s32.totalorder %s2117_s22, 1  ;;  %p1814_p7 = scmp.lt.s32.totalorder %s2054_s21, 2 }
  0x41   : > { %s2228_s27 = scalar_select %p27_p6, %s2050_s20, %s29_s14  }
  0x42   : > { %p2222_p5 = por %p2579_p3, %p36_p13  ;;  %p38_p9 = por %p37_p10, %p36_p13 }
  0x43   : > { %s208_s30 = sand.u32 1, %s2050_s20   ;;  %s1475_s6 = sshll.u32 %s2054_s21, 11 }
  0x44   : > { %s2580_s23 = scalar_select %p2222_p5, 1, 0 }
  0x45   : > { %s1401_s7 = sshll.u32 %s208_s30, 7  ;;  %s2235_s10 = scalar_lea.hbm %s2566_s0, %s1475_s6 }
  0x46   : > { %s212_s11 = scalar_lea.vmem [#allocation2], %s1401_s7  ;;  %p2239_p11 = pnand %p1814_p7, %p38_p9 }
  0x47   : > { %s220_s28 = sshll.u32 %s212_s11, 4  ;;  %s2243_s13 = scalar_lea.sflag [#allocation3], %s208_s30  ;;  %s2237_s28 = int_to_ptr.vmem [resolvable:$true] %s220_s28 }
  0x48   : > { %s1954_s14 = scalar_lea.hbm %s2235_s10, 2048  ;;  %p1956_p0 = pneg %p2239_p11 }
  0x49   : > { %p1955_p12 = scmp.ne.s32.totalorder %s2235_s10, %s1954_s14  ;;  %s1959_s6 = scalar_lea.hbm %s2566_s0, 4096 }
  0x4a   : > { %p1960_p13 = scmp.lt.u32.totalorder %s2235_s10, %s2566_s0  ;;  %p1961_p6 = scmp.lt.u32.totalorder %s1959_s6, %s1954_s14 }
  0x4b   : > { %p1957_p1 = pnand %p1956_p0, %p1955_p12  ;;  %p1963_p3 = scmp.lt.u32.totalorder %s1954_s14, %s2235_s10 }
  0x4c   : > { %p1962_p10 = por %p1961_p6, %p1960_p13 }
  0x4d   : > { %p1958_p2 = pneg %p1957_p1 }
  0x4e   : > { %p1964_p7 = por %p1963_p3, %p1962_p10 }
  0x50   : > { %p1965_p9 = pnand %p1964_p7, %p1958_p2 }
  0x52   : > { %1968 = shalt.err (!%p1965_p9)
}
  0x53   : > { %s1969_s30 = scalar_lea.vmem %s2237_s28, 2048  ;;  %s2060_s11 = smov [#allocation2]  }
  0x54   : > { %p1970_p12 = scmp.ne.s32.totalorder %s2237_s28, %s1969_s30  ;;  %s1974_s17 = sshll.u32 %s2060_s11, 4  ;;  %s1975_s17 = int_to_ptr.vmem [resolvable:$false] %s1974_s17 }
  0x55   : > { %s1976_s7 = scalar_lea.vmem %s1975_s17, 4096  ;;  %p1977_p4 = scmp.lt.s32.totalorder %s2237_s28, %s1975_s17 }
  0x56   : > { %p1972_p1 = pnand %p1970_p12, %p1956_p0  ;;  %p1978_p13 = scmp.lt.s32.totalorder %s1976_s7, %s1969_s30 }
  0x58   : > { %p1973_p5 = pneg %p1972_p1  ;;  %p1979_p6 = por %p1978_p13, %p1977_p4 }
  0x5a   : > { %p1980_p10 = pnand %p1979_p6, %p1973_p5 }
  0x5c   : > { %1983 = shalt.err (!%p1980_p10)
}
  0x5d   : > { %1807 = dma.hbm_to_vmem [thread:$0]  (!%p2239_p11), %s2235_s10, 2048, %s2237_s28, %s2243_s13, %s2058_s15, %s2058_s15, %s2059_s16  }
  0x5e   : > { %232 = sbr.rel (%p2136_p8) target bundleno = 1617 (0x651), region = 40  ;;  %s2277_s14 = sand.u32 (!%p2136_p8), 1, %s2046_s19  }
  0x5f   : > { %s1406_s6 = sshll.u32 (!%p2136_p8), %s2277_s14, 7  ;;  %s235_s8 = scalar_lea.sflag (!%p2136_p8), [#allocation3], %s2277_s14 }
  0x60   : > { %s2281_s9 = scalar_lea.vmem (!%p2136_p8), [#allocation2], %s1406_s6  ;;  %p2582_p4 = scmp.ne.s32.totalorder (!%p2136_p8), %s2575_s24, 0 }
  0x65   : > { %2029 = dma.done.wait (%p2582_p4), %s235_s8, 2048  }
  0x66   : > { %2031 = vsyncadd (%p2582_p4), %s235_s8, 4294965248  ;;  %p2583_p5 = scmp.eq.s32.totalorder %s2117_s22, 0 }
  0x68   : > { %2033 = dma.done.wait (%p2583_p5), [#allocation6], 3072   ;;  %p2584_p8 = pmov %p2583_p5 }
  0x69   : > { %v2291_v0 = vld [vmem:[#allocation7] sm:$0xff]   ;;  %v2293_v1 = vld [vmem:[#allocation7 + $0x8] sm:$0xff]   ;;  %v2298_v2 = vld [vmem:[#allocation7 + $0x10] sm:$0xff]   ;;  %v2061_v48 = vmov 0.0   ;;  %vm2062_vm0 = vmmov 0   ;;  %s1409_s10 = sshll.u32 %s2277_s14, 4 }
  0x6a   : > { %2035 = vsyncadd (%p2584_p8), [#allocation6], 4294964224  ;;  %1577 = vmatprep.subr.bf16.mxu0 %v2291_v0  ;;  %v2301_v3 = vld [vmem:[#allocation7 + $0x18] sm:$0xff]   ;;  %v1866_v4 = vld [vmem:[%s2281_s9] sm:$0xff]   ;;  %s2486_s13 = scalar_lea.vmem [#allocation8], %s1409_s10  ;;  %s1476_s11 = sshll.u32 %s2117_s22, 8 }
  0x6b   : > { %1578 = vmatpush3.bf16.msra.mxu0 %v2291_v0  ;;  %1593 = vmatprep.mubr.bf16.mxu0 %v1866_v4  ;;  %v2307_v5 = vld [vmem:[#allocation7 + $0x20] sm:$0xff]   ;;  %v2310_v6 = vld [vmem:[#allocation7 + $0x28] sm:$0xff]   ;;  %v2313_v7 = vld [vmem:[#allocation7 + $0x30] sm:$0xff]   ;;  %s1304_s30 = sshll.u32 %s2486_s13, 4  ;;  %s2520_s6 = scalar_lea.hbm %s2571_s5, %s1476_s11  ;;  %s2515_s30 = int_to_ptr.vmem [resolvable:$true] %s1304_s30 }
  0x6c   : > { %1579 = vmatprep.subr.bf16.mxu0 %v2293_v1  ;;  %v2317_v8 = vld [vmem:[#allocation7 + $0x38] sm:$0xff]   ;;  %v1867_v9 = vld [vmem:[%s2281_s9 + $0x8] sm:$0xff]   ;;  %v1868_v10 = vld [vmem:[%s2281_s9 + $0x10] sm:$0xff]   ;;  %s1291_s8 = scalar_lea.sflag [#allocation4], %s2277_s14  ;;  %p2585_p0 = scmp.ne.s32.totalorder %s2580_s23, 0 }
  0x6d   : > { %v1869_v11 = vld [vmem:[%s2281_s9 + $0x18] sm:$0xff]   ;;  %v1870_v12 = vld [vmem:[%s2281_s9 + $0x20] sm:$0xff]   ;;  %v1871_v13 = vld [vmem:[%s2281_s9 + $0x28] sm:$0xff]   ;;  %s2063_s22 = smov [#allocation8]  }
  0x6e   : > { %v1872_v14 = vld [vmem:[%s2281_s9 + $0x30] sm:$0xff]   ;;  %v1873_v15 = vld [vmem:[%s2281_s9 + $0x38] sm:$0xff]   ;;  %v2331_v16 = vld [vmem:[#allocation5] sm:$0xff]   ;;  %s1988_s24 = sshll.u32 %s2063_s22, 4  ;;  %s1989_s24 = int_to_ptr.vmem [resolvable:$false] %s1988_s24 }
  0x6f   : > { %1580 = vmatpush3.bf16.msra.mxu0 %v2293_v1  ;;  %1625 = vmatprep.mubr.bf16.mxu1 %v2331_v16  ;;  %v2334_v41 = vld [vmem:[#allocation5 + $0x8] sm:$0xff]   ;;  %v2336_v42 = vld [vmem:[#allocation5 + $0x10] sm:$0xff]   ;;  %v2340_v43 = vld [vmem:[#allocation5 + $0x18] sm:$0xff]   ;;  %s1990_s26 = scalar_lea.vmem %s1989_s24, 512  ;;  %p1991_p7 = scmp.lt.s32.totalorder %s2515_s30, %s1989_s24 }
  0x70   : > { %1581 = vmatprep.subr.bf16.mxu0 %v2298_v2  ;;  %v2342_v44 = vld [vmem:[#allocation5 + $0x20] sm:$0xff]   ;;  %v2346_v45 = vld [vmem:[#allocation5 + $0x28] sm:$0xff]   ;;  %v2348_v46 = vld [vmem:[#allocation5 + $0x30] sm:$0xff]  }
  0x71   : > { %v2352_v47 = vld [vmem:[#allocation5 + $0x38] sm:$0xff]   ;;  %v2361_v49 = vld [vmem:[#allocation7 + $0x40] sm:$0xff]   ;;  %v2364_v50 = vld [vmem:[#allocation7 + $0x48] sm:$0xff]  }
  0x72   : > { %v2368_v51 = vld [vmem:[#allocation7 + $0x50] sm:$0xff]   ;;  %v2372_v52 = vld [vmem:[#allocation7 + $0x58] sm:$0xff]   ;;  %v2376_v53 = vld [vmem:[#allocation7 + $0x60] sm:$0xff]  }
  0x73   : > { %1582 = vmatpush3.bf16.msra.mxu0 %v2298_v2  ;;  %v2380_v54 = vld [vmem:[#allocation7 + $0x68] sm:$0xff]   ;;  %v2384_v55 = vld [vmem:[#allocation7 + $0x70] sm:$0xff]   ;;  %v2392_v56 = vld [vmem:[%s2570_s4] ss:$0 sm:$0xff] }
  0x74   : > { %1583 = vmatprep.subr.bf16.mxu0 %v2301_v3 }
  0x77   : > { %1584 = vmatpush3.bf16.msra.mxu0 %v2301_v3 }
  0x78   : > { %1585 = vmatprep.subr.bf16.mxu0 %v2307_v5 }
  0x7b   : > { %1586 = vmatpush3.bf16.msra.mxu0 %v2307_v5 }
  0x7c   : > { %1587 = vmatprep.subr.bf16.mxu0 %v2310_v6 }
  0x7f   : > { %1588 = vmatpush3.bf16.msra.mxu0 %v2310_v6 }
  0x80   : > { %1589 = vmatprep.subr.bf16.mxu0 %v2313_v7 }
  0x83   : > { %1590 = vmatpush3.bf16.msra.mxu0 %v2313_v7 }
  0x84   : > { %1591 = vmatprep.subr.bf16.mxu0 %v2317_v8 }
  0x87   : > { %1592 = vmatpush3.bf16.msra.mxu0 %v2317_v8 }
  0x88   : > { %1641 = vmatprep.subr.bf16.mxu0 %v2061_v48 }
  0x8a   : > { %1594 = vmatmul.mubr.bf16.vlgmr.msra.gmra.mrb[0].mxu0 %v1867_v9 }
  0x8b   : > { %1597 = vmatprep.mubr.bf16.mxu0 %v1868_v10 }
  0x92   : > { %1598 = vmatmul.mubr.bf16.gmra.mrb[4].mxu0 %v1869_v11 }
  0x93   : > { %1601 = vmatprep.mubr.bf16.mxu0 %v1870_v12 }
  0x9a   : > { %1602 = vmatmul.mubr.bf16.gmra.mrb[8].mxu0 %v1871_v13 }
  0x9b   : > { %1605 = vmatprep.mubr.bf16.mxu0 %v1872_v14 }
  0xa2   : > { %1606 = vmatmul.mubr.bf16.gmra.mrb[12].mxu0 %v1873_v15 }
  0xa3   : > { %1657 = vmatprep.mubr.msk.bf16.mxu0 %vm2062_vm0, %v2061_v48 }
 0x15d   : > { %v1595_v17 = vpop.f32.mrb[0].mxu0 }
 0x15e   : > { %v474_v18 = vpop.f32.mrb[1].mxu0 }
 0x15f   : > { %v1596_v19 = vpop.f32.mrb[2].mxu0 }
 0x160   : > { %v538_v20 = vpack.c.bf16 %v1596_v19, %v1595_v17  ;;  %v477_v21 = vpop.f32.mrb[3].mxu0 }
 0x161   : > { %v537_v22 = vpack.c.bf16 %v477_v21, %v474_v18 }
 0x163   : > { %1609 = vmatprep.subr.bf16.mxu1 %v537_v22 }
 0x164   : > { %1610 = vmatpush3.bf16.msra.mxu1 %v537_v22 }
 0x165   : > { %v1599_v23 = vpop.f32.mrb[4].mxu0  ;;  %1611 = vmatprep.subr.bf16.mxu1 %v538_v20 }
 0x166   : > { %v490_v24 = vpop.f32.mrb[5].mxu0 }
 0x167   : > { %v1600_v25 = vpop.f32.mrb[6].mxu0 }
 0x168   : > { %v540_v26 = vpack.c.bf16 %v1600_v25, %v1599_v23  ;;  %v493_v27 = vpop.f32.mrb[7].mxu0  ;;  %1612 = vmatpush3.bf16.msra.mxu1 %v538_v20 }
 0x169   : > { %v539_v28 = vpack.c.bf16 %v493_v27, %v490_v24 }
 0x16b   : > { %1613 = vmatprep.subr.bf16.mxu1 %v539_v28 }
 0x16c   : > { %1614 = vmatpush3.bf16.msra.mxu1 %v539_v28 }
 0x16d   : > { %v1603_v29 = vpop.f32.mrb[8].mxu0  ;;  %1615 = vmatprep.subr.bf16.mxu1 %v540_v26 }
 0x16e   : > { %v506_v30 = vpop.f32.mrb[9].mxu0 }
 0x16f   : > { %v1604_v31 = vpop.f32.mrb[10].mxu0 }
 0x170   : > { %v542_v32 = vpack.c.bf16 %v1604_v31, %v1603_v29  ;;  %v509_v33 = vpop.f32.mrb[11].mxu0  ;;  %1616 = vmatpush3.bf16.msra.mxu1 %v540_v26 }
 0x171   : > { %v541_v34 = vpack.c.bf16 %v509_v33, %v506_v30 }
 0x173   : > { %1617 = vmatprep.subr.bf16.mxu1 %v541_v34 }
 0x174   : > { %1618 = vmatpush3.bf16.msra.mxu1 %v541_v34 }
 0x175   : > { %v1607_v35 = vpop.f32.mrb[12].mxu0  ;;  %1619 = vmatprep.subr.bf16.mxu1 %v542_v32 }
 0x176   : > { %v522_v36 = vpop.f32.mrb[13].mxu0 }
 0x177   : > { %v1608_v37 = vpop.f32.mrb[14].mxu0 }
 0x178   : > { %v544_v38 = vpack.c.bf16 %v1608_v37, %v1607_v35  ;;  %v525_v39 = vpop.f32.mrb[15].mxu0  ;;  %1620 = vmatpush3.bf16.msra.mxu1 %v542_v32 }
 0x179   : > { %v543_v40 = vpack.c.bf16 %v525_v39, %v522_v36 }
 0x17b   : > { %1621 = vmatprep.subr.bf16.mxu1 %v543_v40 }
 0x17c   : > { %1622 = vmatpush3.bf16.msra.mxu1 %v543_v40 }
 0x17d   : > { %1623 = vmatprep.subr.bf16.mxu1 %v544_v38 }
 0x180   : > { %1624 = vmatpush3.bf16.msra.mxu1 %v544_v38 }
 0x181   : > { %1661 = vmatprep.subr.bf16.mxu1 %v2061_v48 }
 0x183   : > { %1626 = vmatmul.mubr.bf16.vlgmr.msra.gmra.mrb[0].mxu1 %v2334_v41 }
 0x184   : > { %1629 = vmatprep.mubr.bf16.mxu1 %v2336_v42  ;;  %1662 = vmatpush3.bf16.msra.mxu1 %v2361_v49 }
 0x185   : > { %1663 = vmatprep.subr.bf16.mxu1 %v2061_v48 }
 0x188   : > { %1664 = vmatpush3.bf16.msra.mxu1 %v2364_v50 }
 0x189   : > { %1665 = vmatprep.subr.bf16.mxu1 %v2061_v48 }
 0x18b   : > { %1630 = vmatmul.mubr.bf16.gmra.mrb[4].mxu1 %v2340_v43 }
 0x18c   : > { %1633 = vmatprep.mubr.bf16.mxu1 %v2342_v44  ;;  %1666 = vmatpush3.bf16.msra.mxu1 %v2368_v51 }
 0x18d   : > { %1667 = vmatprep.subr.bf16.mxu1 %v2061_v48 }
 0x190   : > { %1668 = vmatpush3.bf16.msra.mxu1 %v2372_v52 }
 0x191   : > { %1669 = vmatprep.subr.bf16.mxu1 %v2061_v48 }
 0x193   : > { %1634 = vmatmul.mubr.bf16.gmra.mrb[8].mxu1 %v2346_v45 }
 0x194   : > { %1637 = vmatprep.mubr.bf16.mxu1 %v2348_v46  ;;  %1670 = vmatpush3.bf16.msra.mxu1 %v2376_v53 }
 0x195   : > { %1671 = vmatprep.subr.bf16.mxu1 %v2061_v48 }
 0x198   : > { %1672 = vmatpush3.bf16.msra.mxu1 %v2380_v54 }
 0x199   : > { %1673 = vmatprep.subr.bf16.mxu1 %v2061_v48 }
 0x19b   : > { %1638 = vmatmul.mubr.bf16.gmra.mrb[12].mxu1 %v2352_v47 }
 0x19c   : > { %1677 = vmatprep.mubr.msk.bf16.mxu1 %vm2062_vm0, %v2061_v48  ;;  %1674 = vmatpush3.bf16.msra.mxu1 %v2384_v55 }
 0x19d   : > { %1675 = vmatprep.subr.bf16.mxu1 %v2061_v48 }
 0x256   : > { %v1627_v57 = vpop.f32.mrb[0].mxu1 }
 0x257   : > { %v640_v58 = vadd.f32 %v1627_v57, %v2392_v56  ;;  %v631_v59 = vpop.f32.mrb[1].mxu1 }
 0x258   : > { %v632_v60 = vadd.f32 %v2392_v56, %v631_v59  ;;  %v1628_v61 = vpop.f32.mrb[2].mxu1 }
 0x259   : > { %v712_v62 = vmul.f32 0.01, %v640_v58  ;;  %v643_v63 = vadd.f32 %v1628_v61, %v2392_v56  ;;  %v634_v4 = vpop.f32.mrb[3].mxu1  ;;  %vm696_vm1 = vcmp.gt.f32.partialorder %v640_v58, 0.0 }
 0x25a   : > { %v710_v9 = vmul.f32 0.01, %v632_v60  ;;  %v635_v10 = vadd.f32 %v2392_v56, %v634_v4  ;;  %vm694_vm2 = vcmp.gt.f32.partialorder %v632_v60, 0.0 }
 0x25b   : > { %vm697_vm3 = vcmp.gt.f32.partialorder %v643_v63, 0.0  ;;  %v713_v11 = vmul.f32 0.01, %v643_v63  ;;  %v728_v13 = vsel %vm696_vm1, %v640_v58, %v712_v62 }
 0x25c   : > { %vm695_vm4 = vcmp.gt.f32.partialorder %v635_v10, 0.0  ;;  %v711_v12 = vmul.f32 0.01, %v635_v10  ;;  %v726_v15 = vsel %vm694_vm2, %v632_v60, %v710_v9 }
 0x25d   : > { %v729_v14 = vsel %vm697_vm3, %v643_v63, %v713_v11 }
 0x25e   : > { %v743_v17 = vpack.c.bf16 %v729_v14, %v728_v13  ;;  %v727_v18 = vsel %vm695_vm4, %v635_v10, %v711_v12  ;;  %v1631_v19 = vpop.f32.mrb[4].mxu1 }
 0x25f   : > { %v742_v20 = vpack.c.bf16 %v727_v18, %v726_v15  ;;  %v656_v21 = vadd.f32 %v1631_v19, %v2392_v56  ;;  %v647_v22 = vpop.f32.mrb[5].mxu1 }
 0x260   : > { %v648_v23 = vadd.f32 %v2392_v56, %v647_v22  ;;  %v1632_v24 = vpop.f32.mrb[6].mxu1 }
 0x261   : > { %v716_v25 = vmul.f32 0.01, %v656_v21  ;;  %v659_v26 = vadd.f32 %v1632_v24, %v2392_v56  ;;  %v650_v27 = vpop.f32.mrb[7].mxu1  ;;  %1642 = vmatpush3.bf16.msra.mxu0 %v742_v20  ;;  %vm700_vm5 = vcmp.gt.f32.partialorder %v656_v21, 0.0 }
 0x262   : > { %v714_v28 = vmul.f32 0.01, %v648_v23  ;;  %v651_v29 = vadd.f32 %v2392_v56, %v650_v27  ;;  %1643 = vmatprep.subr.bf16.mxu0 %v2061_v48  ;;  %vm698_vm6 = vcmp.gt.f32.partialorder %v648_v23, 0.0 }
 0x263   : > { %vm701_vm7 = vcmp.gt.f32.partialorder %v659_v26, 0.0  ;;  %v717_v30 = vmul.f32 0.01, %v659_v26  ;;  %v732_v32 = vsel %vm700_vm5, %v656_v21, %v716_v25 }
 0x264   : > { %vm699_vm8 = vcmp.gt.f32.partialorder %v651_v29, 0.0  ;;  %v715_v31 = vmul.f32 0.01, %v651_v29  ;;  %v730_v34 = vsel %vm698_vm6, %v648_v23, %v714_v28 }
 0x265   : > { %v733_v33 = vsel %vm701_vm7, %v659_v26, %v717_v30  ;;  %1644 = vmatpush3.bf16.msra.mxu0 %v743_v17 }
 0x266   : > { %v745_v35 = vpack.c.bf16 %v733_v33, %v732_v32  ;;  %v731_v36 = vsel %vm699_vm8, %v651_v29, %v715_v31  ;;  %v1635_v37 = vpop.f32.mrb[8].mxu1  ;;  %1645 = vmatprep.subr.bf16.mxu0 %v2061_v48 }
 0x267   : > { %v744_v38 = vpack.c.bf16 %v731_v36, %v730_v34  ;;  %v672_v39 = vadd.f32 %v1635_v37, %v2392_v56  ;;  %v663_v40 = vpop.f32.mrb[9].mxu1  ;;  %v1882_v36 = vld [vmem:[%s2281_s9 + $0x40] sm:$0xff]   ;;  %v2450_v37 = vld [vmem:[#allocation7 + $0x78] sm:$0xff]  }
 0x268   : > { %v664_v57 = vadd.f32 %v2392_v56, %v663_v40  ;;  %v1636_v58 = vpop.f32.mrb[10].mxu1  ;;  %1676 = vmatpush3.bf16.msra.mxu1 %v2450_v37 }
 0x269   : > { %v720_v59 = vmul.f32 0.01, %v672_v39  ;;  %v675_v60 = vadd.f32 %v1636_v58, %v2392_v56  ;;  %v666_v61 = vpop.f32.mrb[11].mxu1  ;;  %1646 = vmatpush3.bf16.msra.mxu0 %v744_v38  ;;  %vm704_vm9 = vcmp.gt.f32.partialorder %v672_v39, 0.0 }
 0x26a   : > { %v718_v62 = vmul.f32 0.01, %v664_v57  ;;  %v667_v63 = vadd.f32 %v2392_v56, %v666_v61  ;;  %1647 = vmatprep.subr.bf16.mxu0 %v2061_v48  ;;  %vm702_vm10 = vcmp.gt.f32.partialorder %v664_v57, 0.0 }
 0x26b   : > { %vm705_vm11 = vcmp.gt.f32.partialorder %v675_v60, 0.0  ;;  %v721_v4 = vmul.f32 0.01, %v675_v60  ;;  %v736_v10 = vsel %vm704_vm9, %v672_v39, %v720_v59 }
 0x26c   : > { %vm703_vm12 = vcmp.gt.f32.partialorder %v667_v63, 0.0  ;;  %v719_v9 = vmul.f32 0.01, %v667_v63  ;;  %v734_v12 = vsel %vm702_vm10, %v664_v57, %v718_v62 }
 0x26d   : > { %v737_v11 = vsel %vm705_vm11, %v675_v60, %v721_v4  ;;  %1648 = vmatpush3.bf16.msra.mxu0 %v745_v35  ;;  %v2420_v35 = vld [vmem:[%s2568_s2] sm:$0xf] }
 0x26e   : > { %v747_v13 = vpack.c.bf16 %v737_v11, %v736_v10  ;;  %v735_v14 = vsel %vm703_vm12, %v667_v63, %v719_v9  ;;  %v1639_v15 = vpop.f32.mrb[12].mxu1  ;;  %1649 = vmatprep.subr.bf16.mxu0 %v2061_v48 }
 0x26f   : > { %v746_v17 = vpack.c.bf16 %v735_v14, %v734_v12  ;;  %v688_v18 = vadd.f32 %v1639_v15, %v2392_v56  ;;  %v679_v19 = vpop.f32.mrb[13].mxu1 }
 0x270   : > { %v680_v20 = vadd.f32 %v2392_v56, %v679_v19  ;;  %v1640_v21 = vpop.f32.mrb[14].mxu1 }
 0x271   : > { %v724_v22 = vmul.f32 0.01, %v688_v18  ;;  %v691_v23 = vadd.f32 %v1640_v21, %v2392_v56  ;;  %v682_v24 = vpop.f32.mrb[15].mxu1  ;;  %1650 = vmatpush3.bf16.msra.mxu0 %v746_v17  ;;  %vm708_vm13 = vcmp.gt.f32.partialorder %v688_v18, 0.0 }
 0x272   : > { %v722_v25 = vmul.f32 0.01, %v680_v20  ;;  %v683_v26 = vadd.f32 %v2392_v56, %v682_v24  ;;  %1651 = vmatprep.subr.bf16.mxu0 %v2061_v48  ;;  %vm706_vm14 = vcmp.gt.f32.partialorder %v680_v20, 0.0 }
 0x273   : > { %vm709_vm15 = vcmp.gt.f32.partialorder %v691_v23, 0.0  ;;  %v725_v27 = vmul.f32 0.01, %v691_v23  ;;  %v740_v29 = vsel %vm708_vm13, %v688_v18, %v724_v22 }
 0x274   : > { %vm707_vm1 = vcmp.gt.f32.partialorder %v683_v26, 0.0  ;;  %v723_v28 = vmul.f32 0.01, %v683_v26  ;;  %v738_v31 = vsel %vm706_vm14, %v680_v20, %v722_v25 }
 0x275   : > { %v741_v30 = vsel %vm709_vm15, %v691_v23, %v725_v27  ;;  %1652 = vmatpush3.bf16.msra.mxu0 %v747_v13 }
 0x276   : > { %v749_v32 = vpack.c.bf16 %v741_v30, %v740_v29  ;;  %v739_v33 = vsel %vm707_vm1, %v683_v26, %v723_v28  ;;  %1653 = vmatprep.subr.bf16.mxu0 %v2061_v48 }
 0x277   : > { %v748_v34 = vpack.c.bf16 %v739_v33, %v738_v31 }
 0x279   : > { %1654 = vmatpush3.bf16.msra.mxu0 %v748_v34 }
 0x27a   : > { %1655 = vmatprep.subr.bf16.mxu0 %v2061_v48 }
 0x27d   : > { %1656 = vmatpush3.bf16.msra.mxu0 %v749_v32 }
 0x27e   : > { %1681 = vmatprep.subr.bf16.mxu0 %v2291_v0 }
 0x280   : > { %1658 = vmatmul.mubr.bf16.vlgmr.msra.gmra.mrb[16].mxu0 %v2420_v35 }
 0x281   : > { %1682 = vmatpush3.bf16.msra.mxu0 %v2291_v0  ;;  %1697 = vmatprep.mubr.bf16.mxu0 %v1882_v36  ;;  %v1883_v0 = vld [vmem:[%s2281_s9 + $0x48] sm:$0xff]  }
 0x282   : > { %1683 = vmatprep.subr.bf16.mxu0 %v2293_v1 }
 0x285   : > { %1684 = vmatpush3.bf16.msra.mxu0 %v2293_v1  ;;  %v1884_v1 = vld [vmem:[%s2281_s9 + $0x50] sm:$0xff]  }
 0x286   : > { %1685 = vmatprep.subr.bf16.mxu0 %v2298_v2 }
 0x289   : > { %1686 = vmatpush3.bf16.msra.mxu0 %v2298_v2  ;;  %v1885_v2 = vld [vmem:[%s2281_s9 + $0x58] sm:$0xff]  }
 0x28a   : > { %1687 = vmatprep.subr.bf16.mxu0 %v2301_v3 }
 0x28d   : > { %1688 = vmatpush3.bf16.msra.mxu0 %v2301_v3  ;;  %v1886_v3 = vld [vmem:[%s2281_s9 + $0x60] sm:$0xff]  }
 0x28e   : > { %1689 = vmatprep.subr.bf16.mxu0 %v2307_v5 }
 0x291   : > { %1690 = vmatpush3.bf16.msra.mxu0 %v2307_v5  ;;  %v1887_v5 = vld [vmem:[%s2281_s9 + $0x68] sm:$0xff]  }
 0x292   : > { %1691 = vmatprep.subr.bf16.mxu0 %v2310_v6 }
 0x295   : > { %1692 = vmatpush3.bf16.msra.mxu0 %v2310_v6  ;;  %v1888_v6 = vld [vmem:[%s2281_s9 + $0x70] sm:$0xff]  }
 0x296   : > { %1693 = vmatprep.subr.bf16.mxu0 %v2313_v7 }
 0x299   : > { %1694 = vmatpush3.bf16.msra.mxu0 %v2313_v7  ;;  %v1889_v7 = vld [vmem:[%s2281_s9 + $0x78] sm:$0xff]   ;;  %s1984_s9 = scalar_lea.vmem %s2515_s30, 256 }
 0x29a   : > { %1695 = vmatprep.subr.bf16.mxu0 %v2317_v8  ;;  %p1985_p11 = scmp.ne.s32.totalorder %s2515_s30, %s1984_s9  ;;  %p1992_p9 = scmp.lt.s32.totalorder %s1990_s26, %s1984_s9 }
 0x29c   : > { %p1986_p2 = pnand %p1985_p11, %p2585_p0  ;;  %p1993_p12 = por %p1992_p9, %p1991_p7 }
 0x29d   : > { %1696 = vmatpush3.bf16.msra.mxu0 %v2317_v8 }
 0x29e   : > { %1745 = vmatprep.subr.bf16.mxu0 %v2061_v48  ;;  %p1987_p3 = pneg %p1986_p2 }
 0x2a0   : > { %1698 = vmatmul.mubr.bf16.vlgmr.msra.gmra.mrb[20].mxu0 %v1883_v0  ;;  %p1994_p1 = pnand %p1993_p12, %p1987_p3 }
 0x2a1   : > { %1701 = vmatprep.mubr.bf16.mxu0 %v1884_v1 }
 0x2a8   : > { %1702 = vmatmul.mubr.bf16.gmra.mrb[24].mxu0 %v1885_v2 }
 0x2a9   : > { %1705 = vmatprep.mubr.bf16.mxu0 %v1886_v3 }
 0x2b0   : > { %1706 = vmatmul.mubr.bf16.gmra.mrb[28].mxu0 %v1887_v5 }
 0x2b1   : > { %1709 = vmatprep.mubr.bf16.mxu0 %v1888_v6 }
 0x2b8   : > { %1710 = vmatmul.mubr.bf16.gmra.mrb[32].mxu0 %v1889_v7 }
 0x2b9   : > { %1761 = vmatprep.mubr.msk.bf16.mxu0 %vm2062_vm0, %v2061_v48 }
 0x353   : > { %v784_v8 = vpop.f32.mrb[16].mxu0 }
 0x354   : > { %v790_v38 = vpack.c.bf16 %v784_v8, %v784_v8  ;;  %v1659_v39 = vpop.f32.mrb[17].mxu0 }
 0x355   : > { %v787_v40 = vpop.f32.mrb[18].mxu0 }
 0x356   : > { %v1660_v57 = vpop.f32.mrb[19].mxu0  ;;  %1678 = vmatmul.mubr.bf16.vlgmr.msra.gmra.mrb[16].mxu1 %v790_v38 }
 0x357   : > { %1729 = vmatprep.mubr.bf16.mxu1 %v2331_v16 }
 0x373   : > { %v1699_v58 = vpop.f32.mrb[20].mxu0 }
 0x374   : > { %v983_v59 = vpop.f32.mrb[21].mxu0 }
 0x375   : > { %v1700_v60 = vpop.f32.mrb[22].mxu0 }
 0x376   : > { %v1047_v61 = vpack.c.bf16 %v1700_v60, %v1699_v58  ;;  %v986_v62 = vpop.f32.mrb[23].mxu0 }
 0x377   : > { %v1046_v63 = vpack.c.bf16 %v986_v62, %v983_v59 }
 0x379   : > { %1713 = vmatprep.subr.bf16.mxu1 %v1046_v63 }
 0x37a   : > { %1714 = vmatpush3.bf16.msra.mxu1 %v1046_v63 }
 0x37b   : > { %v1703_v4 = vpop.f32.mrb[24].mxu0  ;;  %1715 = vmatprep.subr.bf16.mxu1 %v1047_v61 }
 0x37c   : > { %v999_v9 = vpop.f32.mrb[25].mxu0 }
 0x37d   : > { %v1704_v10 = vpop.f32.mrb[26].mxu0 }
 0x37e   : > { %v1049_v11 = vpack.c.bf16 %v1704_v10, %v1703_v4  ;;  %v1002_v12 = vpop.f32.mrb[27].mxu0  ;;  %1716 = vmatpush3.bf16.msra.mxu1 %v1047_v61 }
 0x37f   : > { %v1048_v13 = vpack.c.bf16 %v1002_v12, %v999_v9 }
 0x381   : > { %1717 = vmatprep.subr.bf16.mxu1 %v1048_v13 }
 0x382   : > { %1718 = vmatpush3.bf16.msra.mxu1 %v1048_v13 }
 0x383   : > { %v1707_v14 = vpop.f32.mrb[28].mxu0  ;;  %1719 = vmatprep.subr.bf16.mxu1 %v1049_v11 }
 0x384   : > { %v1015_v16 = vpop.f32.mrb[29].mxu0 }
 0x385   : > { %v1708_v15 = vpop.f32.mrb[30].mxu0 }
 0x386   : > { %v1051_v17 = vpack.c.bf16 %v1708_v15, %v1707_v14  ;;  %v1018_v18 = vpop.f32.mrb[31].mxu0  ;;  %1720 = vmatpush3.bf16.msra.mxu1 %v1049_v11 }
 0x387   : > { %v1050_v19 = vpack.c.bf16 %v1018_v18, %v1015_v16 }
 0x389   : > { %1721 = vmatprep.subr.bf16.mxu1 %v1050_v19 }
 0x38a   : > { %1722 = vmatpush3.bf16.msra.mxu1 %v1050_v19 }
 0x38b   : > { %v1711_v20 = vpop.f32.mrb[32].mxu0  ;;  %1723 = vmatprep.subr.bf16.mxu1 %v1051_v17 }
 0x38c   : > { %v1031_v21 = vpop.f32.mrb[33].mxu0 }
 0x38d   : > { %v1712_v22 = vpop.f32.mrb[34].mxu0 }
 0x38e   : > { %v1053_v23 = vpack.c.bf16 %v1712_v22, %v1711_v20  ;;  %v1034_v24 = vpop.f32.mrb[35].mxu0  ;;  %1724 = vmatpush3.bf16.msra.mxu1 %v1051_v17 }
 0x38f   : > { %v1052_v25 = vpack.c.bf16 %v1034_v24, %v1031_v21 }
 0x391   : > { %1725 = vmatprep.subr.bf16.mxu1 %v1052_v25 }
 0x392   : > { %1726 = vmatpush3.bf16.msra.mxu1 %v1052_v25 }
 0x393   : > { %1727 = vmatprep.subr.bf16.mxu1 %v1053_v23 }
 0x396   : > { %1728 = vmatpush3.bf16.msra.mxu1 %v1053_v23 }
 0x397   : > { %1765 = vmatprep.subr.bf16.mxu1 %v2061_v48 }
 0x399   : > { %1730 = vmatmul.mubr.bf16.vlgmr.msra.gmra.mrb[20].mxu1 %v2334_v41  ;;  %v2483_v41 = vld [vmem:[%s2570_s4 + $0x1] ss:$0 sm:$0xff] }
 0x39a   : > { %1733 = vmatprep.mubr.bf16.mxu1 %v2336_v42  ;;  %1766 = vmatpush3.bf16.msra.mxu1 %v2361_v49 }
 0x39b   : > { %1767 = vmatprep.subr.bf16.mxu1 %v2061_v48 }
 0x39e   : > { %1768 = vmatpush3.bf16.msra.mxu1 %v2364_v50 }
 0x39f   : > { %1769 = vmatprep.subr.bf16.mxu1 %v2061_v48 }
 0x3a1   : > { %1734 = vmatmul.mubr.bf16.gmra.mrb[24].mxu1 %v2340_v43 }
 0x3a2   : > { %1737 = vmatprep.mubr.bf16.mxu1 %v2342_v44  ;;  %1770 = vmatpush3.bf16.msra.mxu1 %v2368_v51 }
 0x3a3   : > { %1771 = vmatprep.subr.bf16.mxu1 %v2061_v48 }
 0x3a6   : > { %1772 = vmatpush3.bf16.msra.mxu1 %v2372_v52 }
 0x3a7   : > { %1773 = vmatprep.subr.bf16.mxu1 %v2061_v48 }
 0x3a9   : > { %1738 = vmatmul.mubr.bf16.gmra.mrb[28].mxu1 %v2346_v45 }
 0x3aa   : > { %1741 = vmatprep.mubr.bf16.mxu1 %v2348_v46  ;;  %1774 = vmatpush3.bf16.msra.mxu1 %v2376_v53 }
 0x3ab   : > { %1775 = vmatprep.subr.bf16.mxu1 %v2061_v48 }
 0x3ae   : > { %1776 = vmatpush3.bf16.msra.mxu1 %v2380_v54 }
 0x3af   : > { %1777 = vmatprep.subr.bf16.mxu1 %v2061_v48 }
 0x3b1   : > { %1742 = vmatmul.mubr.bf16.gmra.mrb[32].mxu1 %v2352_v47 }
 0x3b2   : > { %1778 = vmatpush3.bf16.msra.mxu1 %v2384_v55  ;;  %1781 = vmatprep.mubr.msk.bf16.mxu1 %vm2062_vm0, %v2061_v48 }
 0x3b3   : > { %1779 = vmatprep.subr.bf16.mxu1 %v2061_v48 }
 0x3b6   : > { %1780 = vmatpush3.bf16.msra.mxu1 %v2450_v37 }
 0x429   : > { %v877_v42 = vpop.f32.mrb[16].mxu1 }
 0x42a   : > { %v878_v43 = vadd.f32 %v2483_v41, %v877_v42  ;;  %v1679_v44 = vpop.f32.mrb[17].mxu1 }
 0x42b   : > { %v880_v45 = vpop.f32.mrb[18].mxu1 }
 0x42c   : > { %883 = vst [vmem:[%s2486_s13] sm:$0xff] %v878_v43  ;;  %v1680_v46 = vpop.f32.mrb[19].mxu1 }
 0x46c   : > { %v1731_v47 = vpop.f32.mrb[20].mxu1 }
 0x46d   : > { %v1097_v49 = vadd.f32 %v1731_v47, %v2392_v56  ;;  %v1088_v50 = vpop.f32.mrb[21].mxu1 }
 0x46e   : > { %v1089_v51 = vadd.f32 %v2392_v56, %v1088_v50  ;;  %v1732_v52 = vpop.f32.mrb[22].mxu1 }
 0x46f   : > { %v1169_v53 = vmul.f32 0.01, %v1097_v49  ;;  %v1100_v54 = vadd.f32 %v1732_v52, %v2392_v56  ;;  %v1091_v55 = vpop.f32.mrb[23].mxu1  ;;  %vm1153_vm0 = vcmp.gt.f32.partialorder %v1097_v49, 0.0 }
 0x470   : > { %v1167_v26 = vmul.f32 0.01, %v1089_v51  ;;  %v1092_v27 = vadd.f32 %v2392_v56, %v1091_v55  ;;  %vm1151_vm2 = vcmp.gt.f32.partialorder %v1089_v51, 0.0 }
 0x471   : > { %vm1154_vm3 = vcmp.gt.f32.partialorder %v1100_v54, 0.0  ;;  %v1170_v28 = vmul.f32 0.01, %v1100_v54  ;;  %v1185_v30 = vsel %vm1153_vm0, %v1097_v49, %v1169_v53 }
 0x472   : > { %vm1152_vm4 = vcmp.gt.f32.partialorder %v1092_v27, 0.0  ;;  %v1168_v29 = vmul.f32 0.01, %v1092_v27  ;;  %v1183_v32 = vsel %vm1151_vm2, %v1089_v51, %v1167_v26 }
 0x473   : > { %v1186_v31 = vsel %vm1154_vm3, %v1100_v54, %v1170_v28 }
 0x474   : > { %v1200_v33 = vpack.c.bf16 %v1186_v31, %v1185_v30  ;;  %v1184_v34 = vsel %vm1152_vm4, %v1092_v27, %v1168_v29  ;;  %v1735_v36 = vpop.f32.mrb[24].mxu1 }
 0x475   : > { %v1199_v0 = vpack.c.bf16 %v1184_v34, %v1183_v32  ;;  %v1113_v1 = vadd.f32 %v1735_v36, %v2392_v56  ;;  %v1104_v2 = vpop.f32.mrb[25].mxu1 }
 0x476   : > { %v1105_v3 = vadd.f32 %v2392_v56, %v1104_v2  ;;  %v1736_v5 = vpop.f32.mrb[26].mxu1 }
 0x477   : > { %v1173_v6 = vmul.f32 0.01, %v1113_v1  ;;  %v1116_v7 = vadd.f32 %v1736_v5, %v2392_v56  ;;  %v1107_v37 = vpop.f32.mrb[27].mxu1  ;;  %1746 = vmatpush3.bf16.msra.mxu0 %v1199_v0  ;;  %vm1157_vm5 = vcmp.gt.f32.partialorder %v1113_v1, 0.0 }
 0x478   : > { %v1171_v8 = vmul.f32 0.01, %v1105_v3  ;;  %v1108_v38 = vadd.f32 %v2392_v56, %v1107_v37  ;;  %1747 = vmatprep.subr.bf16.mxu0 %v2061_v48  ;;  %vm1155_vm6 = vcmp.gt.f32.partialorder %v1105_v3, 0.0 }
 0x479   : > { %vm1158_vm7 = vcmp.gt.f32.partialorder %v1116_v7, 0.0  ;;  %v1174_v39 = vmul.f32 0.01, %v1116_v7  ;;  %v1189_v57 = vsel %vm1157_vm5, %v1113_v1, %v1173_v6 }
 0x47a   : > { %vm1156_vm8 = vcmp.gt.f32.partialorder %v1108_v38, 0.0  ;;  %v1172_v40 = vmul.f32 0.01, %v1108_v38  ;;  %v1187_v59 = vsel %vm1155_vm6, %v1105_v3, %v1171_v8 }
 0x47b   : > { %v1190_v58 = vsel %vm1158_vm7, %v1116_v7, %v1174_v39  ;;  %1748 = vmatpush3.bf16.msra.mxu0 %v1200_v33 }
 0x47c   : > { %v1202_v60 = vpack.c.bf16 %v1190_v58, %v1189_v57  ;;  %v1188_v61 = vsel %vm1156_vm8, %v1108_v38, %v1172_v40  ;;  %v1739_v62 = vpop.f32.mrb[28].mxu1  ;;  %1749 = vmatprep.subr.bf16.mxu0 %v2061_v48 }
 0x47d   : > { %v1201_v63 = vpack.c.bf16 %v1188_v61, %v1187_v59  ;;  %v1129_v4 = vadd.f32 %v1739_v62, %v2392_v56  ;;  %v1120_v9 = vpop.f32.mrb[29].mxu1 }
 0x47e   : > { %v1121_v10 = vadd.f32 %v2392_v56, %v1120_v9  ;;  %v1740_v11 = vpop.f32.mrb[30].mxu1 }
 0x47f   : > { %v1177_v12 = vmul.f32 0.01, %v1129_v4  ;;  %v1132_v13 = vadd.f32 %v1740_v11, %v2392_v56  ;;  %v1123_v14 = vpop.f32.mrb[31].mxu1  ;;  %1750 = vmatpush3.bf16.msra.mxu0 %v1201_v63  ;;  %vm1161_vm9 = vcmp.gt.f32.partialorder %v1129_v4, 0.0 }
 0x480   : > { %v1175_v16 = vmul.f32 0.01, %v1121_v10  ;;  %v1124_v15 = vadd.f32 %v2392_v56, %v1123_v14  ;;  %1751 = vmatprep.subr.bf16.mxu0 %v2061_v48  ;;  %vm1159_vm10 = vcmp.gt.f32.partialorder %v1121_v10, 0.0 }
 0x481   : > { %vm1162_vm11 = vcmp.gt.f32.partialorder %v1132_v13, 0.0  ;;  %v1178_v17 = vmul.f32 0.01, %v1132_v13  ;;  %v1193_v19 = vsel %vm1161_vm9, %v1129_v4, %v1177_v12 }
 0x482   : > { %vm1160_vm12 = vcmp.gt.f32.partialorder %v1124_v15, 0.0  ;;  %v1176_v18 = vmul.f32 0.01, %v1124_v15  ;;  %v1191_v21 = vsel %vm1159_vm10, %v1121_v10, %v1175_v16 }
 0x483   : > { %v1194_v20 = vsel %vm1162_vm11, %v1132_v13, %v1178_v17  ;;  %1752 = vmatpush3.bf16.msra.mxu0 %v1202_v60 }
 0x484   : > { %v1204_v22 = vpack.c.bf16 %v1194_v20, %v1193_v19  ;;  %v1192_v23 = vsel %vm1160_vm12, %v1124_v15, %v1176_v18  ;;  %v1743_v24 = vpop.f32.mrb[32].mxu1  ;;  %1753 = vmatprep.subr.bf16.mxu0 %v2061_v48 }
 0x485   : > { %v1203_v25 = vpack.c.bf16 %v1192_v23, %v1191_v21  ;;  %v1145_v42 = vadd.f32 %v1743_v24, %v2392_v56  ;;  %v1136_v43 = vpop.f32.mrb[33].mxu1 }
 0x486   : > { %v1137_v44 = vadd.f32 %v2392_v56, %v1136_v43  ;;  %v1744_v45 = vpop.f32.mrb[34].mxu1 }
 0x487   : > { %v1181_v46 = vmul.f32 0.01, %v1145_v42  ;;  %v1148_v47 = vadd.f32 %v1744_v45, %v2392_v56  ;;  %v1139_v49 = vpop.f32.mrb[35].mxu1  ;;  %1754 = vmatpush3.bf16.msra.mxu0 %v1203_v25  ;;  %vm1165_vm13 = vcmp.gt.f32.partialorder %v1145_v42, 0.0 }
 0x488   : > { %v1179_v50 = vmul.f32 0.01, %v1137_v44  ;;  %v1140_v51 = vadd.f32 %v2392_v56, %v1139_v49  ;;  %1755 = vmatprep.subr.bf16.mxu0 %v2061_v48  ;;  %vm1163_vm14 = vcmp.gt.f32.partialorder %v1137_v44, 0.0 }
 0x489   : > { %vm1166_vm15 = vcmp.gt.f32.partialorder %v1148_v47, 0.0  ;;  %v1182_v52 = vmul.f32 0.01, %v1148_v47  ;;  %v1197_v54 = vsel %vm1165_vm13, %v1145_v42, %v1181_v46 }
 0x48a   : > { %vm1164_vm1 = vcmp.gt.f32.partialorder %v1140_v51, 0.0  ;;  %v1180_v53 = vmul.f32 0.01, %v1140_v51  ;;  %v1195_v26 = vsel %vm1163_vm14, %v1137_v44, %v1179_v50 }
 0x48b   : > { %v1198_v55 = vsel %vm1166_vm15, %v1148_v47, %v1182_v52  ;;  %1756 = vmatpush3.bf16.msra.mxu0 %v1204_v22 }
 0x48c   : > { %v1206_v27 = vpack.c.bf16 %v1198_v55, %v1197_v54  ;;  %v1196_v28 = vsel %vm1164_vm1, %v1140_v51, %v1180_v53  ;;  %1757 = vmatprep.subr.bf16.mxu0 %v2061_v48 }
 0x48d   : > { %v1205_v29 = vpack.c.bf16 %v1196_v28, %v1195_v26 }
 0x48f   : > { %1758 = vmatpush3.bf16.msra.mxu0 %v1205_v29 }
 0x490   : > { %1759 = vmatprep.subr.bf16.mxu0 %v2061_v48 }
 0x493   : > { %1760 = vmatpush3.bf16.msra.mxu0 %v1206_v27 }
 0x496   : > { %1762 = vmatmul.mubr.bf16.vlgmr.msra.gmra.mrb[36].mxu0 %v2420_v35 }
 0x569   : > { %v1241_v56 = vpop.f32.mrb[36].mxu0 }
 0x56a   : > { %v1247_v30 = vpack.c.bf16 %v1241_v56, %v1241_v56  ;;  %v1763_v31 = vpop.f32.mrb[37].mxu0 }
 0x56b   : > { %v1244_v32 = vpop.f32.mrb[38].mxu0 }
 0x56c   : > { %v1764_v33 = vpop.f32.mrb[39].mxu0  ;;  %1782 = vmatmul.mubr.bf16.vlgmr.msra.gmra.mrb[36].mxu1 %v1247_v30 }
 0x63f   : > { %v1282_v34 = vpop.f32.mrb[36].mxu1 }
 0x640   : > { %v1283_v48 = vadd.f32 %v2483_v41, %v1282_v34  ;;  %v1783_v35 = vpop.f32.mrb[37].mxu1 }
 0x641   : > { %v1285_v36 = vpop.f32.mrb[38].mxu1 }
 0x642   : > { %1468 = vst [vmem:[%s2486_s13 + $0x8] sm:$0xff] %v1283_v48  ;;  %v1784_v0 = vpop.f32.mrb[39].mxu1 }
 0x643   : > { %1997 = shalt.err (!%p1994_p1)
}
 0x644   : > { %s1998_s15 = scalar_lea.hbm %s2520_s6, 256  ;;  %s2002_s28 = scalar_lea.hbm %s2571_s5, 512 }
 0x645   : > { %p1999_p13 = scmp.ne.s32.totalorder %s2520_s6, %s1998_s15  ;;  %p2003_p4 = scmp.lt.u32.totalorder %s2520_s6, %s2571_s5 }
 0x646   : > { %p2004_p5 = scmp.lt.u32.totalorder %s2002_s28, %s1998_s15  ;;  %p2006_p11 = scmp.lt.u32.totalorder %s1998_s15, %s2520_s6 }
 0x647   : > { %p2000_p6 = pnand %p1999_p13, %p2585_p0 }
 0x648   : > { %p2005_p8 = por %p2004_p5, %p2003_p4 }
 0x649   : > { %p2001_p10 = pneg %p2000_p6 }
 0x64a   : > { %p2007_p2 = por %p2006_p11, %p2005_p8 }
 0x64c   : > { %p2008_p3 = pnand %p2007_p2, %p2001_p10 }
 0x64e   : > { %2011 = shalt.err (!%p2008_p3)
}
 0x64f   : > { %s2064_s11 = smov 128   ;;  %s2065_s17 = smov 8  }
 0x650   : > { %1795 = dma.vmem_to_hbm [thread:$0]  (%p2585_p0), %s2515_s30, 256, %s2520_s6, %s1291_s8, %s2064_s11, %s2064_s11, %s2065_s17  }
 0x651 PF: > { %s1319_s7 = sand.u32 1, %s2042_s18   ;;  %p2586_p7 = scmp.ne.s32.totalorder %s2576_s25, 0 }
 0x652   : > { %p2587_p9 = scmp.ge.s32.totalorder %s2054_s21, 2  ;;  %s1320_s9 = scalar_lea.sflag [#allocation4], %s1319_s7 }
 0x654   : > { %p1809_p12 = pnand %p2587_p9, %p2586_p7 }
 0x656   : > { %2037 = dma.done.wait (!%p1809_p12), %s1320_s9, 256  }
 0x657   : > { %2039 = vsyncadd (!%p1809_p12), %s1320_s9, 4294967040  ;;  %p19_p1 = scmp.ge.s32.totalorder %s2212_s29, 4   ;;  %s2588_s18 = smov %s2046_s19 }
 0x658   : > { %s2589_s19 = smov %s2050_s20  ;;  %s2590_s20 = smov %s2228_s27 }
 0x659   : > { %s2591_s21 = smov %s2212_s29  ;;  %21 = sbr.rel (!%p19_p1) target bundleno = 6 (0x6), region = 96 }
 0x660   :  { %1325 = vsyncpa [#allocation3], 1 }
 0x661   :  { %1327 = vsyncpa [#allocation3 + $0x1], 1 }
 0x662   :  { %1328 = vsyncpa [#allocation6], 1 }
 0x663   :  { %1329 = vsyncpa [#allocation4], 1 }
 0x664   :  { %1331 = vsyncpa [#allocation4 + $0x1], 1 }

</bundles_post_ra>
